<compile_context>
chip_gen: v7x
topology: tpu7x:2x2x1
jax: 0.10.0
libtpu: 0.0.40
codegen_flags: <defaults>
</compile_context>

<pallas_src>
import functools
import math

import jax
import jax.numpy as jnp
from jax import lax
from jax.experimental import pallas as pl
from jax.experimental.pallas import tpu as pltpu


# ---------------- small helpers ----------------

def _gelu(x):
    # tanh-approx GELU: transcendental runs in the (otherwise idle) EUP slot.
    # TODO(synk): ~1e-3 abs difference vs torch's exact erf GELU.
    c = 0.7978845608028654  # sqrt(2/pi)
    return 0.5 * x * (1.0 + jnp.tanh(c * (x + 0.044715 * x * x * x)))


def _round_up(v, m):
    return ((v + m - 1) // m) * m


def _pick_row_tile(m, cap=512):
    # Largest multiple-of-8 divisor of m <= cap, else the full extent (always legal).
    if m <= cap or m % 8 != 0:
        return m
    for t in range(cap - cap % 8, 7, -8):
        if m % t == 0:
            return t
    return m


def _vmem_capacity_bytes():
    # Generation-aware VMEM budget (v7x: 64 MiB, v5e/v6e: 128 MiB).
    try:
        info = pltpu.get_tpu_info()
        cap = getattr(info, "vmem_capacity_bytes", None)
        if cap:
            return int(cap)
    except Exception:
        pass
    return 128 * 1024 * 1024


# ---------------- projection kernels ----------------

def _proj_kernel(x_ref, wqkv_ref, bqkv_ref, wskip_ref, bskip_ref,
                 q_ref, kv_ref, skip_ref):
    # x -> [q | k | v] (bf16, 1/sqrt(C) folded into q at init) and skip (f32).
    xb = x_ref[...].astype(jnp.bfloat16)
    qkv = (jnp.dot(xb, wqkv_ref[...], preferred_element_type=jnp.float32)
           + bqkv_ref[...]).astype(jnp.bfloat16)
    hc = q_ref.shape[1]
    q_ref[...] = qkv[:, :hc]            # lane slice at a 128 boundary
    kv_ref[...] = qkv[:, hc:]
    skip_ref[...] = (jnp.dot(xb, wskip_ref[...], preferred_element_type=jnp.float32)
                     + bskip_ref[...])


def _project(x_pad, params):
    n_pad, nin = x_pad.shape
    hc = params["heads"] * params["out_channels"]
    bf16 = jnp.bfloat16
    tr = _pick_row_tile(n_pad)
    grid = (n_pad // tr,)
    return pl.pallas_call(
        _proj_kernel,
        out_shape=(jax.ShapeDtypeStruct((n_pad, hc), bf16),
                   jax.ShapeDtypeStruct((n_pad, 2 * hc), bf16),
                   jax.ShapeDtypeStruct((n_pad, nin), jnp.float32)),
        grid_spec=pltpu.PrefetchScalarGridSpec(
            num_scalar_prefetch=0, grid=grid,
            in_specs=[pl.BlockSpec((tr, nin), lambda i: (i, 0)),
                      pl.BlockSpec((nin, 3 * hc), lambda i: (0, 0)),
                      pl.BlockSpec((1, 3 * hc), lambda i: (0, 0)),
                      pl.BlockSpec((nin, nin), lambda i: (0, 0)),
                      pl.BlockSpec((1, nin), lambda i: (0, 0))],
            out_specs=[pl.BlockSpec((tr, hc), lambda i: (i, 0)),
                       pl.BlockSpec((tr, 2 * hc), lambda i: (i, 0)),
                       pl.BlockSpec((tr, nin), lambda i: (i, 0))]),
        compiler_params=pltpu.CompilerParams(dimension_semantics=("parallel",)),
    )(x_pad, params["w_qkv"].astype(bf16), params["b_qkv"],
      params["w_skip"].astype(bf16), params["b_skip"])


def _linear_nobias_kernel(x_ref, w_ref, o_ref):
    o_ref[...] = jnp.dot(x_ref[...].astype(jnp.bfloat16), w_ref[...],
                         preferred_element_type=jnp.float32).astype(o_ref.dtype)


def _edge_proj(edge_attr, w_edge_bf16):
    e_rows, nin = edge_attr.shape
    hc = w_edge_bf16.shape[1]
    tr = _pick_row_tile(e_rows)
    grid = (e_rows // tr,)
    return pl.pallas_call(
        _linear_nobias_kernel,
        out_shape=jax.ShapeDtypeStruct((e_rows, hc), jnp.bfloat16),
        grid_spec=pltpu.PrefetchScalarGridSpec(
            num_scalar_prefetch=0, grid=grid,
            in_specs=[pl.BlockSpec((tr, nin), lambda i: (i, 0)),
                      pl.BlockSpec((nin, hc), lambda i: (0, 0))],
            out_specs=pl.BlockSpec((tr, hc), lambda i: (i, 0))),
        compiler_params=pltpu.CompilerParams(dimension_semantics=("parallel",)),
    )(edge_attr, w_edge_bf16)


# ---------------- TransformerConv attention kernel (+ fused epilogue) ----------------

def _attn_kernel(q_ref, kv_ref, e_ref, bias_ref, hedge_ref, skip_ref, w0_ref,
                 x0_ref, h0_ref, *, heads, c):
    # One dst tile of TransformerConv (concat=False, root_weight=True) message
    # passing over a densified adjacency, followed by head-mean + skip + F.gelu
    # (GCNConv.forward) and the first (bias-free) MLP linear fused into the epilogue.
    f32 = jnp.float32
    td = q_ref.shape[0]
    hc = heads * c
    bias = bias_ref[...]                                     # (td, S) additive 0 / -1e30
    acc = jnp.zeros((td, c), f32)
    for h in range(heads):                                   # static 4-way unroll
        qh = q_ref[:, h * c:(h + 1) * c]                     # (td, C) bf16, scale folded
        kh = kv_ref[:, h * c:(h + 1) * c]                    # (S,  C) bf16
        vh = kv_ref[:, hc + h * c:hc + (h + 1) * c]          # (S,  C) bf16
        eh = e_ref[:, h * c:(h + 1) * c, :].astype(f32)      # (td, C, S) src-minor (lane dense)
        # q.kT on the MXU; q.e edge bias as VPU multiply + sublane reduce (overlaps MXU)
        s = lax.dot_general(qh, kh, (((1,), (1,)), ((), ())),
                            preferred_element_type=f32)      # (td, S)
        s = s + jnp.sum(qh.astype(f32)[:, :, None] * eh, axis=1)
        s = s + bias                                         # masked entries ~ -1e30
        s = s - jnp.max(s, axis=-1, keepdims=True)
        p = jnp.exp(s)
        alpha = p * pl.reciprocal(jnp.sum(p, axis=-1, keepdims=True), approx=True)
        # alpha @ v on the MXU; alpha.e value term as VPU multiply + lane reduce
        agg = jnp.dot(alpha.astype(jnp.bfloat16), vh, preferred_element_type=f32)
        agg = agg + jnp.sum(alpha[:, None, :] * eh, axis=2)
        acc = acc + agg
    # head mean; has-edges guard zeroes isolated / padded dst rows (softmax of empty set)
    msg = acc * (hedge_ref[...] * (1.0 / heads))
    x0 = _gelu(msg + skip_ref[...])                          # root/skip add + F.gelu
    x0_ref[...] = x0                                         # kept for the MLP residual
    h0_ref[...] = jnp.dot(x0.astype(jnp.bfloat16), w0_ref[...],  # fused first MLP linear
                          preferred_element_type=f32)


def _attn_tile_bytes(td, n_pad, hc, c, nin):
    db = 2  # double buffering of pipelined blocks
    per_tile = (db * td * hc * n_pad * 2       # lane-dense edge tile (bf16)
                + db * td * n_pad * 4          # additive mask bias (f32)
                + db * td * hc * 2             # q tile (bf16)
                + db * td * nin * 4            # skip tile (f32)
                + db * td * 128 * 4            # has-edges column (lane padded)
                + db * 2 * td * nin * 4)       # x0 / h0 output tiles (f32)
    resident = db * n_pad * 2 * hc * 2 + db * nin * nin * 2   # k|v and w0 (bf16)
    workspace = 3 * td * c * n_pad * 4         # in-kernel f32 mul-reduce temporaries
    return per_tile + resident + workspace


def _pick_tile_dst(n_pad, hc, c, nin, budget_bytes, cap=1024):
    best, t = 128, 128
    while t <= min(n_pad, cap):
        if n_pad % t == 0 and _attn_tile_bytes(t, n_pad, hc, c, nin) <= budget_bytes:
            best = t
        t += 128
    return best


# ---------------- MLP tail kernels (row-tiled, stats between stages) ----------------

def _bn_gelu_linear_kernel(h_ref, mu_ref, var_ref, g_ref, b_ref, w_ref, o_ref, *, eps):
    hn = (h_ref[...] - mu_ref[...]) * lax.rsqrt(var_ref[...] + eps) * g_ref[...] + b_ref[...]
    o_ref[...] = jnp.dot(_gelu(hn).astype(jnp.bfloat16), w_ref[...],
                         preferred_element_type=jnp.float32)


def _bn_gelu_residual_kernel(*refs, eps, residual):
    if residual:
        y_ref, mu_ref, var_ref, g_ref, b_ref, x0_ref, o_ref = refs
    else:
        y_ref, mu_ref, var_ref, g_ref, b_ref, o_ref = refs
    yn = (y_ref[...] - mu_ref[...]) * lax.rsqrt(var_ref[...] + eps) * g_ref[...] + b_ref[...]
    yn = _gelu(yn)
    if residual:
        yn = yn + x0_ref[...]
    o_ref[...] = yn


def _mlp_tail(x0, h0, params, *, eps=1e-5):
    # MLP(nin, nout, 2, with_final_activation=True, with_norm=True):
    #   Linear(no bias) -> BatchNorm1d(batch stats) -> GELU, twice, + residual (nin==nout).
    # The first Linear is fused into the attention epilogue (h0). BatchNorm batch
    # statistics are tiny XLA reductions between the row-tiled Pallas stages so the
    # heavy work runs on a "parallel" grid (both TensorCores on v7x).
    n, nin = h0.shape
    nout = params["nout"]
    residual = (params["nin"] == params["nout"])
    bf16 = jnp.bfloat16
    tr = _pick_row_tile(n)
    grid = (n // tr,)
    par = pltpu.CompilerParams(dimension_semantics=("parallel",))

    mu0 = jnp.mean(h0, axis=0, keepdims=True)
    var0 = jnp.mean(jnp.square(h0 - mu0), axis=0, keepdims=True)
    y = pl.pallas_call(
        functools.partial(_bn_gelu_linear_kernel, eps=eps),
        out_shape=jax.ShapeDtypeStruct((n, nout), jnp.float32),
        grid_spec=pltpu.PrefetchScalarGridSpec(
            num_scalar_prefetch=0, grid=grid,
            in_specs=[pl.BlockSpec((tr, nin), lambda i: (i, 0)),
                      pl.BlockSpec((1, nin), lambda i: (0, 0)),
                      pl.BlockSpec((1, nin), lambda i: (0, 0)),
                      pl.BlockSpec((1, nin), lambda i: (0, 0)),
                      pl.BlockSpec((1, nin), lambda i: (0, 0)),
                      pl.BlockSpec((nin, nout), lambda i: (0, 0))],
            out_specs=pl.BlockSpec((tr, nout), lambda i: (i, 0))),
        compiler_params=par,
    )(h0, mu0, var0, params["g0"], params["bta0"], params["w_mlp1"].astype(bf16))

    mu1 = jnp.mean(y, axis=0, keepdims=True)
    var1 = jnp.mean(jnp.square(y - mu1), axis=0, keepdims=True)
    in_specs = [pl.BlockSpec((tr, nout), lambda i: (i, 0)),
                pl.BlockSpec((1, nout), lambda i: (0, 0)),
                pl.BlockSpec((1, nout), lambda i: (0, 0)),
                pl.BlockSpec((1, nout), lambda i: (0, 0)),
                pl.BlockSpec((1, nout), lambda i: (0, 0))]
    args = [y, mu1, var1, params["g1"], params["bta1"]]
    if residual:
        in_specs.append(pl.BlockSpec((tr, nin), lambda i: (i, 0)))
        args.append(x0)
    return pl.pallas_call(
        functools.partial(_bn_gelu_residual_kernel, eps=eps, residual=residual),
        out_shape=jax.ShapeDtypeStruct((n, nout), jnp.float32),
        grid_spec=pltpu.PrefetchScalarGridSpec(
            num_scalar_prefetch=0, grid=grid,
            in_specs=in_specs,
            out_specs=pl.BlockSpec((tr, nout), lambda i: (i, 0))),
        compiler_params=par,
    )(*args)


# ---------------- parameters & forward wrapper ----------------

def init_params(key, nin, nout, heads):
    c = nin  # TransformerConv out_channels = nin
    hc = heads * c
    ks = jax.random.split(key, 11)
    s = 0.1
    scale = 1.0 / math.sqrt(c)
    w_q = jax.random.normal(ks[0], (nin, hc), jnp.float32) * s
    w_k = jax.random.normal(ks[1], (nin, hc), jnp.float32) * s
    w_v = jax.random.normal(ks[2], (nin, hc), jnp.float32) * s
    b_q = jax.random.normal(ks[3], (1, hc), jnp.float32) * s
    b_k = jax.random.normal(ks[4], (1, hc), jnp.float32) * s
    b_v = jax.random.normal(ks[5], (1, hc), jnp.float32) * s
    return dict(
        heads=heads, out_channels=c, nin=nin, nout=nout,
        # softmax 1/sqrt(C) folded into the query projection at init
        w_qkv=jnp.concatenate([w_q * scale, w_k, w_v], axis=1),   # (nin, 3*hc)
        b_qkv=jnp.concatenate([b_q * scale, b_k, b_v], axis=1),   # (1,   3*hc)
        w_skip=jax.random.normal(ks[6], (nin, nin), jnp.float32) * s,  # lin_skip (bias=True)
        b_skip=jax.random.normal(ks[7], (1, nin), jnp.float32) * s,
        w_edge=jax.random.normal(ks[8], (nin, hc), jnp.float32) * s,   # lin_edge: bias=False
        w_mlp0=jax.random.normal(ks[9], (nin, nin), jnp.float32) * s,  # MLP linears: bias=False
        w_mlp1=jax.random.normal(ks[10], (nin, nout), jnp.float32) * s,
        g0=jnp.ones((1, nin), jnp.float32), bta0=jnp.zeros((1, nin), jnp.float32),
        g1=jnp.ones((1, nout), jnp.float32), bta1=jnp.zeros((1, nout), jnp.float32),
    )


def gcn_conv_forward(params, x, edge_index, edge_attr, *, tile_dst=None):
    n, nin = x.shape
    heads, c = params["heads"], params["out_channels"]
    hc = heads * c
    bf16 = jnp.bfloat16
    n_pad = max(_round_up(n, 128), 128)     # lane-dense src/dst axes, predictable tiling

    # --- fused projections (Pallas; bf16 MXU inputs, f32 accumulate) ---
    x_pad = jnp.zeros((n_pad, nin), jnp.float32).at[:n].set(x)
    q, kv, skip = _project(x_pad, params)                       # bf16 q/kv, f32 skip
    e = _edge_proj(edge_attr, params["w_edge"].astype(bf16))    # (E, hc) bf16, no bias

    # --- densify the sparse graph (plain-JAX glue), lane-dense src-minor layout ---
    # TODO(synk): replace with a CSR (sort-by-dst) scalar-prefetch + make_async_copy
    # per-dst-tile gather so edge memory scales O(E*H*C) instead of O(N^2*H*C).
    # NOTE: duplicate (src, dst) edges overwrite instead of giving two softmax terms.
    src, dst = edge_index[0], edge_index[1]                     # messages flow src -> dst
    e_dense = (jnp.zeros((n_pad, n_pad, hc), bf16).at[dst, src].set(e)
               .transpose(0, 2, 1))                             # (N_dst, H*C, N_src)
    bias = jnp.full((n_pad, n_pad), -1e30, jnp.float32).at[dst, src].set(0.0)
    has_edges = jnp.zeros((n_pad,), jnp.float32).at[dst].set(1.0).reshape(n_pad, 1)

    # --- attention + skip + GELU + first MLP linear, tiled over destination nodes ---
    vmem_cap = _vmem_capacity_bytes()
    td = tile_dst if tile_dst is not None else _pick_tile_dst(
        n_pad, hc, c, nin, budget_bytes=vmem_cap // 2)
    if n_pad % td != 0 or td % 128 != 0:
        td = 128
    need = _attn_tile_bytes(td, n_pad, hc, c, nin)
    vmem_limit = min(int(vmem_cap * 0.65), max(need + (8 << 20), 32 << 20))
    grid = (n_pad // td,)
    x0_pad, h0_pad = pl.pallas_call(
        functools.partial(_attn_kernel, heads=heads, c=c),
        out_shape=(jax.ShapeDtypeStruct((n_pad, nin), jnp.float32),
                   jax.ShapeDtypeStruct((n_pad, nin), jnp.float32)),
        grid_spec=pltpu.PrefetchScalarGridSpec(
            num_scalar_prefetch=0, grid=grid,
            in_specs=[
                pl.BlockSpec((td, hc), lambda i: (i, 0)),             # q   (dst tile)
                pl.BlockSpec((n_pad, 2 * hc), lambda i: (0, 0)),      # k|v (all src)
                pl.BlockSpec((td, hc, n_pad), lambda i: (i, 0, 0)),   # edge feats (lane dense)
                pl.BlockSpec((td, n_pad), lambda i: (i, 0)),          # additive mask bias
                pl.BlockSpec((td, 1), lambda i: (i, 0)),              # has-edges guard
                pl.BlockSpec((td, nin), lambda i: (i, 0)),            # skip
                pl.BlockSpec((nin, nin), lambda i: (0, 0)),           # w_mlp0 (fused)
            ],
            out_specs=[pl.BlockSpec((td, nin), lambda i: (i, 0)),
                       pl.BlockSpec((td, nin), lambda i: (i, 0))]),
        compiler_params=pltpu.CompilerParams(
            dimension_semantics=("parallel",),                        # megacore split on v7x
            vmem_limit_bytes=vmem_limit),
    )(q, kv, e_dense, bias, has_edges, skip, params["w_mlp0"].astype(bf16))

    # drop dst padding before BatchNorm statistics (padded rows must not bias them)
    x0, h0 = x0_pad[:n], h0_pad[:n]

    # --- remaining MLP: BN -> GELU -> Linear -> BN -> GELU (+ residual), row-tiled ---
    return _mlp_tail(x0, h0, params)


if __name__ == "__main__":
    N, NIN, NOUT, HEADS = 32, 32, 32, 4
    key = jax.random.PRNGKey(0)
    k_param, k_x, k_e = jax.random.split(key, 3)
    params = init_params(k_param, NIN, NOUT, HEADS)

    x = jax.random.normal(k_x, (N, NIN), jnp.float32)
    # deterministic small graph: each node i receives edges from i-1, i-2, i-5 (mod N)
    offsets = (1, 2, 5)
    dst = jnp.concatenate([jnp.arange(N, dtype=jnp.int32)] * len(offsets))
    src = jnp.concatenate([(jnp.arange(N, dtype=jnp.int32) - o) % N for o in offsets])
    edge_index = jnp.stack([src, dst], axis=0)          # (2, E), PyG convention
    E = int(edge_index.shape[1])
    edge_attr = jax.random.normal(k_e, (E, NIN), jnp.float32)

    out = gcn_conv_forward(params, x, edge_index, edge_attr)
    jax.block_until_ready(out)
    assert out.shape == (N, NOUT)
    assert bool(jnp.all(jnp.isfinite(out)))
    print("KERNEL_OK")
</pallas_src>

<mosaic_0001>
module attributes {stable_mosaic.version = 11 : i64} {
  func.func @_proj_kernel(%arg0: i32, %arg1: memref<128x32xf32, #tpu.memory_space<vmem>>, %arg2: memref<32x384xbf16, #tpu.memory_space<vmem>>, %arg3: memref<1x384xf32, #tpu.memory_space<vmem>>, %arg4: memref<32x32xbf16, #tpu.memory_space<vmem>>, %arg5: memref<1x32xf32, #tpu.memory_space<vmem>>, %arg6: memref<128x128xbf16, #tpu.memory_space<vmem>>, %arg7: memref<128x256xbf16, #tpu.memory_space<vmem>>, %arg8: memref<128x32xf32, #tpu.memory_space<vmem>>) attributes {dimension_semantics = [#tpu.dimension_semantics<parallel>], iteration_bounds = array<i64: 1>, scalar_prefetch = 0 : i64, scratch_operands = 0 : i64, tpu.core_type = #tpu.core_type<tc>, window_params = [{transform_indices = @transform_0, window_bounds = array<i64: 128, 32>}, {pipeline_mode = #tpu.pipeline_mode<synchronous>, transform_indices = @transform_1, window_bounds = array<i64: 32, 384>}, {pipeline_mode = #tpu.pipeline_mode<synchronous>, transform_indices = @transform_2, window_bounds = array<i64: 1, 384>}, {pipeline_mode = #tpu.pipeline_mode<synchronous>, transform_indices = @transform_3, window_bounds = array<i64: 32, 32>}, {pipeline_mode = #tpu.pipeline_mode<synchronous>, transform_indices = @transform_4, window_bounds = array<i64: 1, 32>}, {transform_indices = @transform_5, window_bounds = array<i64: 128, 128>}, {transform_indices = @transform_6, window_bounds = array<i64: 128, 256>}, {transform_indices = @transform_7, window_bounds = array<i64: 128, 32>}]} {
    %c0 = arith.constant 0 : index
    %c0_0 = arith.constant 0 : index
    %0 = vector.load %arg1[%c0, %c0_0] : memref<128x32xf32, #tpu.memory_space<vmem>>, vector<128x32xf32>
    %1 = arith.truncf %0 : vector<128x32xf32> to vector<128x32xbf16>
    %c0_1 = arith.constant 0 : index
    %c0_2 = arith.constant 0 : index
    %2 = vector.load %arg2[%c0_1, %c0_2] : memref<32x384xbf16, #tpu.memory_space<vmem>>, vector<32x384xbf16>
    %cst = arith.constant dense<0.000000e+00> : vector<128x384xf32>
    %3 = tpu.matmul %1, %2, %cst {dimension_numbers = #tpu.dot_dimension_numbers<[1], [0], [0], [1], [0, 0, 1, 1], [], []>} : vector<128x32xbf16>, vector<32x384xbf16>, vector<128x384xf32> -> vector<128x384xf32>
    %c0_3 = arith.constant 0 : index
    %c0_4 = arith.constant 0 : index
    %4 = vector.load %arg3[%c0_3, %c0_4] : memref<1x384xf32, #tpu.memory_space<vmem>>, vector<1x384xf32>
    %5 = vector.broadcast %4 : vector<1x384xf32> to vector<128x384xf32>
    %6 = arith.addf %3, %5 : vector<128x384xf32>
    %7 = arith.truncf %6 : vector<128x384xf32> to vector<128x384xbf16>
    %8 = vector.extract_strided_slice %7 {offsets = [0, 0], sizes = [128, 128], strides = [1, 1]} : vector<128x384xbf16> to vector<128x128xbf16>
    %c0_5 = arith.constant 0 : index
    %c0_6 = arith.constant 0 : index
    %9 = vector.load %arg6[%c0_5, %c0_6] : memref<128x128xbf16, #tpu.memory_space<vmem>>, vector<128x128xbf16>
    tpu.vector_store %arg6[%c0_5, %c0_6], %8 {strides = array<i32>} : memref<128x128xbf16, #tpu.memory_space<vmem>>, vector<128x128xbf16>,
    %10 = vector.extract_strided_slice %7 {offsets = [0, 128], sizes = [128, 256], strides = [1, 1]} : vector<128x384xbf16> to vector<128x256xbf16>
    %c0_7 = arith.constant 0 : index
    %c0_8 = arith.constant 0 : index
    %11 = vector.load %arg7[%c0_7, %c0_8] : memref<128x256xbf16, #tpu.memory_space<vmem>>, vector<128x256xbf16>
    tpu.vector_store %arg7[%c0_7, %c0_8], %10 {strides = array<i32>} : memref<128x256xbf16, #tpu.memory_space<vmem>>, vector<128x256xbf16>,
    %c0_9 = arith.constant 0 : index
    %c0_10 = arith.constant 0 : index
    %12 = vector.load %arg4[%c0_9, %c0_10] : memref<32x32xbf16, #tpu.memory_space<vmem>>, vector<32x32xbf16>
    %cst_11 = arith.constant dense<0.000000e+00> : vector<128x32xf32>
    %13 = tpu.matmul %1, %12, %cst_11 {dimension_numbers = #tpu.dot_dimension_numbers<[1], [0], [0], [1], [0, 0, 1, 1], [], []>} : vector<128x32xbf16>, vector<32x32xbf16>, vector<128x32xf32> -> vector<128x32xf32>
    %c0_12 = arith.constant 0 : index
    %c0_13 = arith.constant 0 : index
    %14 = vector.load %arg5[%c0_12, %c0_13] : memref<1x32xf32, #tpu.memory_space<vmem>>, vector<1x32xf32>
    %15 = vector.broadcast %14 : vector<1x32xf32> to vector<128x32xf32>
    %16 = arith.addf %13, %15 : vector<128x32xf32>
    %c0_14 = arith.constant 0 : index
    %c0_15 = arith.constant 0 : index
    %17 = vector.load %arg8[%c0_14, %c0_15] : memref<128x32xf32, #tpu.memory_space<vmem>>, vector<128x32xf32>
    tpu.vector_store %arg8[%c0_14, %c0_15], %16 {strides = array<i32>} : memref<128x32xf32, #tpu.memory_space<vmem>>, vector<128x32xf32>,
    return
  }
  func.func @transform_0(%arg0: i32) -> (i32, i32) {
    %c0_i32 = arith.constant 0 : i32
    %c0_i32_0 = arith.constant 0 : i32
    return %arg0, %c0_i32 : i32, i32
  }
  func.func @transform_1(%arg0: i32) -> (i32, i32) {
    %c0_i32 = arith.constant 0 : i32
    %c0_i32_0 = arith.constant 0 : i32
    %c0_i32_1 = arith.constant 0 : i32
    return %c0_i32, %c0_i32_0 : i32, i32
  }
  func.func @transform_2(%arg0: i32) -> (i32, i32) {
    %c0_i32 = arith.constant 0 : i32
    %c0_i32_0 = arith.constant 0 : i32
    %c0_i32_1 = arith.constant 0 : i32
    return %c0_i32, %c0_i32_0 : i32, i32
  }
  func.func @transform_3(%arg0: i32) -> (i32, i32) {
    %c0_i32 = arith.constant 0 : i32
    %c0_i32_0 = arith.constant 0 : i32
    %c0_i32_1 = arith.constant 0 : i32
    return %c0_i32, %c0_i32_0 : i32, i32
  }
  func.func @transform_4(%arg0: i32) -> (i32, i32) {
    %c0_i32 = arith.constant 0 : i32
    %c0_i32_0 = arith.constant 0 : i32
    %c0_i32_1 = arith.constant 0 : i32
    return %c0_i32, %c0_i32_0 : i32, i32
  }
  func.func @transform_5(%arg0: i32) -> (i32, i32) {
    %c0_i32 = arith.constant 0 : i32
    %c0_i32_0 = arith.constant 0 : i32
    return %arg0, %c0_i32 : i32, i32
  }
  func.func @transform_6(%arg0: i32) -> (i32, i32) {
    %c0_i32 = arith.constant 0 : i32
    %c0_i32_0 = arith.constant 0 : i32
    return %arg0, %c0_i32 : i32, i32
  }
  func.func @transform_7(%arg0: i32) -> (i32, i32) {
    %c0_i32 = arith.constant 0 : i32
    %c0_i32_0 = arith.constant 0 : i32
    return %arg0, %c0_i32 : i32, i32
  }
}

</mosaic_0001>

<bundles_post_ra>
// kernel: tpu_custom_call.1
= control target key start
LH: loop header
LB: loop body
LE: loop exit
PB: predicated region body
PF: predicated region fallthrough
CT: control target
= control target key end

     0   :  { %13 = vsyncpa [#allocation3], 0  ;;  %v975_v2 = vmov 0   ;;  %vm107_vm0 = vcmask 261120   ;;  %s1317_s0 = inlined_call_operand.vmem [shape: f32[128,32], index: 0, kind: input, shape index: {}]   ;;  %s1318_s1 = inlined_call_operand.vmem [shape: bf16[32,384], index: 1, kind: input, shape index: {}]   ;;  %s1319_s2 = inlined_call_operand.vmem [shape: f32[1,384], index: 2, kind: input, shape index: {}]   ;;  %s1320_s3 = inlined_call_operand.vmem [shape: bf16[32,32], index: 3, kind: input, shape index: {}]   ;;  %s1321_s4 = inlined_call_operand.vmem [shape: f32[1,32], index: 4, kind: input, shape index: {}]   ;;  %s1322_s5 = inlined_call_operand.hbm [shape: bf16[128,128], index: 5, kind: output, shape index: {0}]   ;;  %s1323_s6 = inlined_call_operand.hbm [shape: bf16[128,256], index: 6, kind: output, shape index: {1}]   ;;  %s1324_s7 = inlined_call_operand.vmem [shape: f32[128,32], index: 7, kind: output, shape index: {2}]  }
   0x1   :  { %v917_v0 = vld [vmem:[%s1318_s1 + $0x4] ss:$12 sps:$4 sm:$0xff]   ;;  %v919_v1 = vld [vmem:[%s1318_s1 + $0x8] ss:$12 sps:$4 sm:$0xff]   ;;  %164 = vmatprep.mubr.bf16.mxu0 %v975_v2  ;;  %v920_v3 = vld [vmem:[%s1318_s1] ss:$12 sps:$4 sm:$0xff]  }
   0x2   :  { %132 = vmatprep.subr.bf16.mxu0 %v917_v0  ;;  %870 = vmatprep.subr.bf16.mxu1 %v919_v1  ;;  %v921_v4 = vld [vmem:[%s1318_s1 + $0x1c] ss:$12 sps:$4 sm:$0xff]   ;;  %v923_v5 = vld [vmem:[%s1318_s1 + $0x20] ss:$12 sps:$4 sm:$0xff]   ;;  %v924_v6 = vld [vmem:[%s1318_s1 + $0x18] ss:$12 sps:$4 sm:$0xff]  }
   0x3   :  { %133 = vmatpush1.bf16.msra.mxu0 %v920_v3  ;;  %871 = vmatpush3.bf16.msra.mxu1 %v919_v1  ;;  %v26_v7 = vld [vmem:[%s1317_s0] sm:$0xff]  ;;  %v27_v8 = vld [vmem:[%s1317_s0 + $0x8] sm:$0xff]  ;;  %v28_v9 = vld [vmem:[%s1317_s0 + $0x10] sm:$0xff] }
   0x4   :  { %134 = vmatprep.subr.bf16.mxu0 %v921_v4  ;;  %v29_v10 = vld [vmem:[%s1317_s0 + $0x18] sm:$0xff]  ;;  %872 = vmatprep.subr.bf16.mxu1 %v923_v5  ;;  %v42_v11 = vpack.c.bf16 %v27_v8, %v26_v7  ;;  %v925_v12 = vld [vmem:[%s1320_s3] sm:$0xff]   ;;  %v31_v15 = vld [vmem:[%s1317_s0 + $0x28] sm:$0xff] }
   0x5   :  { %v43_v13 = vpack.c.bf16 %v29_v10, %v28_v9  ;;  %v30_v14 = vld [vmem:[%s1317_s0 + $0x20] sm:$0xff]  ;;  %v926_v17 = vld [vmem:[%s1320_s3 + $0x8] sm:$0xff]   ;;  %v32_v18 = vld [vmem:[%s1317_s0 + $0x30] sm:$0xff] }
   0x6   :  { %874 = vmatprep.mubr.msk.bf16.mxu1 %vm107_vm0, %v42_v11  ;;  %v44_v16 = vpack.c.bf16 %v31_v15, %v30_v14  ;;  %v33_v19 = vld [vmem:[%s1317_s0 + $0x38] sm:$0xff] }
   0x7   :  { %135 = vmatpush1.bf16.msra.mxu0 %v924_v6  ;;  %873 = vmatpush3.bf16.msra.mxu1 %v923_v5 }
   0x8   :  { %890 = vmatprep.subr.bf16.mxu1 %v925_v12 }
   0xa   :  { %712 = vmatmul.mubr.msk.bf16.vlgmr.msra.gmra.mrb[0].mxu0 %vm107_vm0, %v42_v11  ;;  %875 = vmatmul.mubr.msk.bf16.vlgmr.msra.gmra.mrb[0].mxu1 %vm107_vm0, %v43_v13 }
   0xb   :  { %891 = vmatpush3.bf16.msra.mxu1 %v925_v12  ;;  %174 = vmatprep.mubr.bf16.mxu0 %v975_v2 }
   0xc   :  { %14 = vsyncpa [#allocation5], 0  ;;  %878 = vmatprep.mubr.msk.bf16.mxu1 %vm107_vm0, %v44_v16  ;;  %v34_v20 = vld [vmem:[%s1317_s0 + $0x40] sm:$0xff]  ;;  %v35_v21 = vld [vmem:[%s1317_s0 + $0x48] sm:$0xff]  ;;  %892 = vmatprep.subr.bf16.mxu1 %v926_v17  ;;  %v45_v22 = vpack.c.bf16 %v33_v19, %v32_v18  ;;  %v60_v33 = vlaneseq }
   0xd   :  { %v46_v23 = vpack.c.bf16 %v35_v21, %v34_v20  ;;  %v36_v24 = vld [vmem:[%s1317_s0 + $0x50] sm:$0xff]  ;;  %v37_v25 = vld [vmem:[%s1317_s0 + $0x58] sm:$0xff]  ;;  %v38_v26 = vld [vmem:[%s1317_s0 + $0x60] sm:$0xff] }
   0xe   :  { %v39_v27 = vld [vmem:[%s1317_s0 + $0x68] sm:$0xff]  ;;  %v47_v28 = vpack.c.bf16 %v37_v25, %v36_v24  ;;  %v40_v30 = vld [vmem:[%s1317_s0 + $0x70] sm:$0xff]  ;;  %v41_v31 = vld [vmem:[%s1317_s0 + $0x78] sm:$0xff]  ;;  %v61_v34 = vshrl.u32 %v60_v33, 7  ;;  %s976_s0 = smov [#allocation2]  }
   0xf   :  { %893 = vmatpush3.bf16.msra.mxu1 %v926_v17  ;;  %v48_v29 = vpack.c.bf16 %v39_v27, %v38_v26  ;;  %v49_v32 = vpack.c.bf16 %v41_v31, %v40_v30  ;;  %v58_v37 = vld [vmem:[%s1319_s2] sm:$0x7]  ;;  %s675_s23 = sshll.u32 %s976_s0, 4  ;;  %s977_s2 = smov [#allocation4]   ;;  %s676_s23 = int_to_ptr.vmem [resolvable:$true] %s675_s23 }
  0x10   :  { %v70_v35 = vsub.s32 2, %v61_v34  ;;  %v66_v36 = vsub.s32 1, %v61_v34  ;;  %v62_v38 = vsub.s32 0, %v61_v34  ;;  %s687_s24 = sshll.u32 %s977_s2, 4  ;;  %s927_s9 = scalar_lea.vmem %s676_s23, 1024  ;;  %s1282_s24 = int_to_ptr.vmem [resolvable:$true] %s687_s24 }
  0x11   :  { %p928_p0 = scmp.ne.s32.totalorder %s676_s23, %s927_s9  ;;  %p932_p1 = scmp.lt.s32.totalorder %s676_s23, %s676_s23 }
  0x12   :  { %713 = vmatmul.mubr.msk.bf16.gmra.mrb[4].mxu0 %vm107_vm0, %v43_v13  ;;  %879 = vmatmul.mubr.msk.bf16.gmra.mrb[4].mxu1 %vm107_vm0, %v45_v22  ;;  %v1129_v39 = vrot.slane %v58_v37, %v70_v35  ;;  %v1131_v40 = vrot.slane %v58_v37, %v66_v36  ;;  %v1133_v41 = vrot.slane %v58_v37, %v62_v38  ;;  %p933_p2 = scmp.lt.s32.totalorder %s927_s9, %s927_s9 }
  0x13   :  { %184 = vmatprep.mubr.bf16.mxu0 %v975_v2  ;;  %882 = vmatprep.mubr.msk.bf16.mxu1 %vm107_vm0, %v46_v23 }
  0x14   :  { %p934_p3 = por %p933_p2, %p932_p1 }
  0x16   :  { %p935_p4 = pnand %p934_p3, %p928_p0 }
  0x1a   :  { %714 = vmatmul.mubr.msk.bf16.gmra.mrb[8].mxu0 %vm107_vm0, %v44_v16  ;;  %883 = vmatmul.mubr.msk.bf16.gmra.mrb[8].mxu1 %vm107_vm0, %v47_v28 }
  0x1b   :  { %194 = vmatprep.mubr.bf16.mxu0 %v975_v2  ;;  %886 = vmatprep.mubr.msk.bf16.mxu1 %vm107_vm0, %v48_v29 }
  0x22   :  { %715 = vmatmul.mubr.msk.bf16.gmra.mrb[12].mxu0 %vm107_vm0, %v45_v22  ;;  %887 = vmatmul.mubr.msk.bf16.gmra.mrb[12].mxu1 %vm107_vm0, %v49_v32 }
  0x23   :  { %204 = vmatprep.mubr.bf16.mxu0 %v975_v2  ;;  %894 = vmatprep.mubr.msk.bf16.mxu1 %vm107_vm0, %v42_v11 }
  0x2a   :  { %716 = vmatmul.mubr.msk.bf16.gmra.mrb[16].mxu0 %vm107_vm0, %v46_v23  ;;  %895 = vmatmul.mubr.msk.bf16.vlgmr.msra.gmra.mrb[16].mxu1 %vm107_vm0, %v43_v13 }
  0x2b   :  { %214 = vmatprep.mubr.bf16.mxu0 %v975_v2  ;;  %898 = vmatprep.mubr.msk.bf16.mxu1 %vm107_vm0, %v44_v16 }
  0x32   :  { %717 = vmatmul.mubr.msk.bf16.gmra.mrb[20].mxu0 %vm107_vm0, %v47_v28  ;;  %899 = vmatmul.mubr.msk.bf16.gmra.mrb[20].mxu1 %vm107_vm0, %v45_v22 }
  0x33   :  { %224 = vmatprep.mubr.bf16.mxu0 %v975_v2  ;;  %902 = vmatprep.mubr.msk.bf16.mxu1 %vm107_vm0, %v46_v23 }
  0x3a   :  { %718 = vmatmul.mubr.msk.bf16.gmra.mrb[24].mxu0 %vm107_vm0, %v48_v29  ;;  %903 = vmatmul.mubr.msk.bf16.gmra.mrb[24].mxu1 %vm107_vm0, %v47_v28 }
  0x3b   :  { %234 = vmatprep.mubr.bf16.mxu0 %v975_v2  ;;  %906 = vmatprep.mubr.msk.bf16.mxu1 %vm107_vm0, %v48_v29 }
  0x42   :  { %719 = vmatmul.mubr.msk.bf16.gmra.mrb[28].mxu0 %vm107_vm0, %v49_v32  ;;  %907 = vmatmul.mubr.msk.bf16.gmra.mrb[28].mxu1 %vm107_vm0, %v49_v32 }
  0xdd   :  { %v166_v42 = vpop.f32.mrb[0].mxu0  ;;  %v876_v43 = vpop.f32.mrb[0].mxu1 }
  0xde   :  { %v168_v44 = vpop.f32.mrb[1].mxu0  ;;  %v279_v45 = vpop.f32.mrb[1].mxu1  ;;  %v167_v50 = vadd.f32 %v166_v42, %v1133_v41  ;;  %v288_v63 = vadd.f32 %v876_v43, %v1129_v39 }
  0xdf   :  { %v169_v46 = vadd.f32 %v168_v44, %v1131_v40  ;;  %v280_v47 = vadd.f32 %v279_v45, %v1129_v39  ;;  %v170_v48 = vpop.f32.mrb[2].mxu0  ;;  %v877_v49 = vpop.f32.mrb[2].mxu1 }
  0xe0   :  { %v171_v51 = vadd.f32 %v170_v48, %v1133_v41  ;;  %v172_v52 = vpop.f32.mrb[3].mxu0  ;;  %v282_v53 = vpop.f32.mrb[3].mxu1  ;;  %v291_v7 = vadd.f32 %v877_v49, %v1129_v39  ;;  %v1174_v49 = vld [vmem:[%s1321_s4] ss:$0 sm:$0xff] }
  0xe1   :  { %v787_v54 = vpack.c.bf16 %v280_v47, %v169_v46  ;;  %v173_v55 = vadd.f32 %v172_v52, %v1131_v40  ;;  %v283_v56 = vadd.f32 %v282_v53, %v1129_v39 }
  0xe2   :  { %v806_v57 = vpack.c.bf16 %v171_v51, %v167_v50 }
  0xe3   :  { %518 = vst [vmem:[#allocation4] sm:$0xff] %v787_v54  ;;  %v788_v58 = vpack.c.bf16 %v283_v56, %v173_v55 }
  0xe4   :  { %807 = vst [vmem:[#allocation2] sm:$0xff] %v806_v57  }
  0xe5   :  { %519 = vst [vmem:[#allocation4 + $0x8] sm:$0xff] %v788_v58  ;;  %v176_v59 = vpop.f32.mrb[4].mxu0  ;;  %v880_v60 = vpop.f32.mrb[4].mxu1 }
  0xe6   :  { %v178_v61 = vpop.f32.mrb[5].mxu0  ;;  %v295_v62 = vpop.f32.mrb[5].mxu1  ;;  %v177_v3 = vadd.f32 %v176_v59, %v1133_v41  ;;  %v304_v33 = vadd.f32 %v880_v60, %v1129_v39 }
  0xe7   :  { %v179_v0 = vadd.f32 %v178_v61, %v1131_v40  ;;  %v180_v1 = vpop.f32.mrb[6].mxu0  ;;  %v881_v2 = vpop.f32.mrb[6].mxu1  ;;  %v296_v16 = vadd.f32 %v295_v62, %v1129_v39 }
  0xe8   :  { %v181_v4 = vadd.f32 %v180_v1, %v1133_v41  ;;  %v182_v5 = vpop.f32.mrb[7].mxu0  ;;  %v298_v6 = vpop.f32.mrb[7].mxu1  ;;  %v307_v44 = vadd.f32 %v881_v2, %v1129_v39 }
  0xe9   :  { %v789_v8 = vpack.c.bf16 %v288_v63, %v179_v0  ;;  %v183_v9 = vadd.f32 %v182_v5, %v1131_v40  ;;  %v299_v24 = vadd.f32 %v298_v6, %v1129_v39 }
  0xea   :  { %v811_v10 = vpack.c.bf16 %v181_v4, %v177_v3 }
  0xeb   :  { %520 = vst [vmem:[#allocation4 + $0x10] sm:$0xff] %v789_v8  ;;  %v790_v11 = vpack.c.bf16 %v291_v7, %v183_v9 }
  0xec   :  { %843 = vst [vmem:[#allocation2 + $0x8] sm:$0xff] %v811_v10  }
  0xed   :  { %521 = vst [vmem:[#allocation4 + $0x18] sm:$0xff] %v790_v11  ;;  %v186_v12 = vpop.f32.mrb[8].mxu0  ;;  %v1147_v13 = vpop.f32.mrb[8].mxu1 }
  0xee   :  { %v188_v14 = vpop.f32.mrb[9].mxu0  ;;  %v311_v15 = vpop.f32.mrb[9].mxu1  ;;  %v187_v20 = vadd.f32 %v186_v12, %v1133_v41  ;;  %v320_v12 = vadd.f32 %v1147_v13, %v1129_v39 }
  0xef   :  { %v189_v17 = vadd.f32 %v188_v14, %v1131_v40  ;;  %v190_v18 = vpop.f32.mrb[10].mxu0  ;;  %v1151_v19 = vpop.f32.mrb[10].mxu1  ;;  %v312_v55 = vadd.f32 %v311_v15, %v1129_v39 }
  0xf0   :  { %v191_v21 = vadd.f32 %v190_v18, %v1133_v41  ;;  %v192_v22 = vpop.f32.mrb[11].mxu0  ;;  %v314_v23 = vpop.f32.mrb[11].mxu1  ;;  %v323_v13 = vadd.f32 %v1151_v19, %v1129_v39 }
  0xf1   :  { %v791_v25 = vpack.c.bf16 %v296_v16, %v189_v17  ;;  %v193_v26 = vadd.f32 %v192_v22, %v1131_v40  ;;  %v315_v1 = vadd.f32 %v314_v23, %v1129_v39 }
  0xf2   :  { %v816_v27 = vpack.c.bf16 %v191_v21, %v187_v20 }
  0xf3   :  { %522 = vst [vmem:[#allocation4 + $0x20] sm:$0xff] %v791_v25  ;;  %v792_v28 = vpack.c.bf16 %v299_v24, %v193_v26 }
  0xf4   :  { %844 = vst [vmem:[#allocation2 + $0x10] sm:$0xff] %v816_v27  }
  0xf5   :  { %523 = vst [vmem:[#allocation4 + $0x28] sm:$0xff] %v792_v28  ;;  %v196_v29 = vpop.f32.mrb[12].mxu0  ;;  %v1157_v30 = vpop.f32.mrb[12].mxu1 }
  0xf6   :  { %v198_v31 = vpop.f32.mrb[13].mxu0  ;;  %v1159_v32 = vpop.f32.mrb[13].mxu1  ;;  %v197_v37 = vadd.f32 %v196_v29, %v1133_v41 }
  0xf7   :  { %v199_v34 = vadd.f32 %v198_v31, %v1131_v40  ;;  %v200_v35 = vpop.f32.mrb[14].mxu0  ;;  %v1163_v36 = vpop.f32.mrb[14].mxu1 }
  0xf8   :  { %v201_v38 = vadd.f32 %v200_v35, %v1133_v41  ;;  %v202_v42 = vpop.f32.mrb[15].mxu0  ;;  %v1167_v43 = vpop.f32.mrb[15].mxu1  ;;  %v328_v35 = vadd.f32 %v1159_v32, %v1129_v39 }
  0xf9   :  { %v793_v45 = vpack.c.bf16 %v304_v33, %v199_v34  ;;  %v203_v46 = vadd.f32 %v202_v42, %v1131_v40  ;;  %v331_v32 = vadd.f32 %v1167_v43, %v1129_v39 }
  0xfa   :  { %v821_v47 = vpack.c.bf16 %v201_v38, %v197_v37 }
  0xfb   :  { %524 = vst [vmem:[#allocation4 + $0x30] sm:$0xff] %v793_v45  ;;  %v794_v48 = vpack.c.bf16 %v307_v44, %v203_v46 }
  0xfc   :  { %845 = vst [vmem:[#allocation2 + $0x18] sm:$0xff] %v821_v47  }
  0xfd   :  { %525 = vst [vmem:[#allocation4 + $0x38] sm:$0xff] %v794_v48  ;;  %v206_v50 = vpop.f32.mrb[16].mxu0  ;;  %v896_v51 = vpop.f32.mrb[16].mxu1 }
  0xfe   :  { %v600_v52 = vadd.f32 %v896_v51, %v1174_v49  ;;  %v208_v53 = vpop.f32.mrb[17].mxu0  ;;  %v591_v54 = vpop.f32.mrb[17].mxu1  ;;  %v207_v60 = vadd.f32 %v206_v50, %v1133_v41 }
  0xff   :  { %v209_v56 = vadd.f32 %v208_v53, %v1131_v40  ;;  %v592_v57 = vadd.f32 %v1174_v49, %v591_v54  ;;  %v210_v58 = vpop.f32.mrb[18].mxu0  ;;  %v897_v59 = vpop.f32.mrb[18].mxu1 }
 0x100   :  { %656 = vst.msk [vmem:[%s1324_s7 + $0x10] sm:$0xff] %vm107_vm0, %v600_v52  ;;  %v211_v61 = vadd.f32 %v210_v58, %v1133_v41  ;;  %v603_v62 = vadd.f32 %v897_v59, %v1174_v49  ;;  %v212_v63 = vpop.f32.mrb[19].mxu0  ;;  %v594_v0 = vpop.f32.mrb[19].mxu1 }
 0x101   :  { %v795_v2 = vpack.c.bf16 %v312_v55, %v209_v56  ;;  %654 = vst.msk [vmem:[%s1324_s7] sm:$0xff] %vm107_vm0, %v592_v57  ;;  %v213_v3 = vadd.f32 %v212_v63, %v1131_v40  ;;  %v595_v4 = vadd.f32 %v1174_v49, %v594_v0 }
 0x102   :  { %v826_v5 = vpack.c.bf16 %v211_v61, %v207_v60  ;;  %657 = vst.msk [vmem:[%s1324_s7 + $0x18] sm:$0xff] %vm107_vm0, %v603_v62  ;;  %v336_v60 = vadd.f32 %v1157_v30, %v1129_v39 }
 0x103   :  { %526 = vst [vmem:[#allocation4 + $0x40] sm:$0xff] %v795_v2  ;;  %v796_v6 = vpack.c.bf16 %v315_v1, %v213_v3  ;;  %655 = vst.msk [vmem:[%s1324_s7 + $0x8] sm:$0xff] %vm107_vm0, %v595_v4 }
 0x104   :  { %846 = vst [vmem:[#allocation2 + $0x20] sm:$0xff] %v826_v5   ;;  %v339_v5 = vadd.f32 %v1163_v36, %v1129_v39 }
 0x105   :  { %527 = vst [vmem:[#allocation4 + $0x48] sm:$0xff] %v796_v6  ;;  %v216_v7 = vpop.f32.mrb[20].mxu0  ;;  %v900_v8 = vpop.f32.mrb[20].mxu1 }
 0x106   :  { %v616_v9 = vadd.f32 %v900_v8, %v1174_v49  ;;  %v218_v10 = vpop.f32.mrb[21].mxu0  ;;  %v607_v11 = vpop.f32.mrb[21].mxu1  ;;  %v217_v18 = vadd.f32 %v216_v7, %v1133_v41 }
 0x107   :  { %v219_v14 = vadd.f32 %v218_v10, %v1131_v40  ;;  %v608_v15 = vadd.f32 %v1174_v49, %v607_v11  ;;  %v220_v16 = vpop.f32.mrb[22].mxu0  ;;  %v901_v17 = vpop.f32.mrb[22].mxu1 }
 0x108   :  { %660 = vst.msk [vmem:[%s1324_s7 + $0x30] sm:$0xff] %vm107_vm0, %v616_v9  ;;  %v221_v20 = vadd.f32 %v220_v16, %v1133_v41  ;;  %v619_v21 = vadd.f32 %v901_v17, %v1174_v49  ;;  %v222_v22 = vpop.f32.mrb[23].mxu0  ;;  %v610_v23 = vpop.f32.mrb[23].mxu1 }
 0x109   :  { %v797_v24 = vpack.c.bf16 %v320_v12, %v219_v14  ;;  %658 = vst.msk [vmem:[%s1324_s7 + $0x20] sm:$0xff] %vm107_vm0, %v608_v15  ;;  %v223_v25 = vadd.f32 %v222_v22, %v1131_v40  ;;  %v611_v26 = vadd.f32 %v1174_v49, %v610_v23 }
 0x10a   :  { %v831_v27 = vpack.c.bf16 %v221_v20, %v217_v18  ;;  %661 = vst.msk [vmem:[%s1324_s7 + $0x38] sm:$0xff] %vm107_vm0, %v619_v21 }
 0x10b   :  { %528 = vst [vmem:[#allocation4 + $0x50] sm:$0xff] %v797_v24  ;;  %v798_v28 = vpack.c.bf16 %v323_v13, %v223_v25  ;;  %659 = vst.msk [vmem:[%s1324_s7 + $0x28] sm:$0xff] %vm107_vm0, %v611_v26 }
 0x10c   :  { %847 = vst [vmem:[#allocation2 + $0x28] sm:$0xff] %v831_v27  }
 0x10d   :  { %529 = vst [vmem:[#allocation4 + $0x58] sm:$0xff] %v798_v28  ;;  %v226_v19 = vpop.f32.mrb[24].mxu0  ;;  %v904_v29 = vpop.f32.mrb[24].mxu1 }
 0x10e   :  { %v632_v31 = vadd.f32 %v904_v29, %v1174_v49  ;;  %v228_v33 = vpop.f32.mrb[25].mxu0  ;;  %v623_v34 = vpop.f32.mrb[25].mxu1  ;;  %v227_v45 = vadd.f32 %v226_v19, %v1133_v41 }
 0x10f   :  { %v229_v37 = vadd.f32 %v228_v33, %v1131_v40  ;;  %v624_v38 = vadd.f32 %v1174_v49, %v623_v34  ;;  %v230_v42 = vpop.f32.mrb[26].mxu0  ;;  %v905_v44 = vpop.f32.mrb[26].mxu1 }
 0x110   :  { %664 = vst.msk [vmem:[%s1324_s7 + $0x50] sm:$0xff] %vm107_vm0, %v632_v31  ;;  %v231_v46 = vadd.f32 %v230_v42, %v1133_v41  ;;  %v635_v47 = vadd.f32 %v905_v44, %v1174_v49  ;;  %v232_v48 = vpop.f32.mrb[27].mxu0  ;;  %v626_v50 = vpop.f32.mrb[27].mxu1 }
 0x111   :  { %v799_v51 = vpack.c.bf16 %v328_v35, %v229_v37  ;;  %662 = vst.msk [vmem:[%s1324_s7 + $0x40] sm:$0xff] %vm107_vm0, %v624_v38  ;;  %v233_v52 = vadd.f32 %v232_v48, %v1131_v40  ;;  %v627_v53 = vadd.f32 %v1174_v49, %v626_v50 }
 0x112   :  { %v836_v54 = vpack.c.bf16 %v231_v46, %v227_v45  ;;  %665 = vst.msk [vmem:[%s1324_s7 + $0x58] sm:$0xff] %vm107_vm0, %v635_v47 }
 0x113   :  { %530 = vst [vmem:[#allocation4 + $0x60] sm:$0xff] %v799_v51  ;;  %v800_v55 = vpack.c.bf16 %v331_v32, %v233_v52  ;;  %663 = vst.msk [vmem:[%s1324_s7 + $0x48] sm:$0xff] %vm107_vm0, %v627_v53 }
 0x114   :  { %848 = vst [vmem:[#allocation2 + $0x30] sm:$0xff] %v836_v54  }
 0x115   :  { %531 = vst [vmem:[#allocation4 + $0x68] sm:$0xff] %v800_v55  ;;  %v236_v43 = vpop.f32.mrb[28].mxu0  ;;  %v908_v56 = vpop.f32.mrb[28].mxu1 }
 0x116   :  { %v648_v57 = vadd.f32 %v908_v56, %v1174_v49  ;;  %v238_v58 = vpop.f32.mrb[29].mxu0  ;;  %v639_v59 = vpop.f32.mrb[29].mxu1  ;;  %v237_v1 = vadd.f32 %v236_v43, %v1133_v41 }
 0x117   :  { %v239_v61 = vadd.f32 %v238_v58, %v1131_v40  ;;  %v640_v62 = vadd.f32 %v1174_v49, %v639_v59  ;;  %v240_v63 = vpop.f32.mrb[30].mxu0  ;;  %v909_v0 = vpop.f32.mrb[30].mxu1 }
 0x118   :  { %668 = vst.msk [vmem:[%s1324_s7 + $0x70] sm:$0xff] %vm107_vm0, %v648_v57  ;;  %v241_v2 = vadd.f32 %v240_v63, %v1133_v41  ;;  %v651_v3 = vadd.f32 %v909_v0, %v1174_v49  ;;  %v242_v30 = vpop.f32.mrb[31].mxu0  ;;  %v642_v4 = vpop.f32.mrb[31].mxu1 }
 0x119   :  { %v801_v6 = vpack.c.bf16 %v336_v60, %v239_v61  ;;  %666 = vst.msk [vmem:[%s1324_s7 + $0x60] sm:$0xff] %vm107_vm0, %v640_v62  ;;  %v243_v7 = vadd.f32 %v242_v30, %v1131_v40  ;;  %v643_v8 = vadd.f32 %v1174_v49, %v642_v4 }
 0x11a   :  { %v841_v9 = vpack.c.bf16 %v241_v2, %v237_v1  ;;  %669 = vst.msk [vmem:[%s1324_s7 + $0x78] sm:$0xff] %vm107_vm0, %v651_v3 }
 0x11b   :  { %532 = vst [vmem:[#allocation4 + $0x70] sm:$0xff] %v801_v6  ;;  %v802_v39 = vpack.c.bf16 %v339_v5, %v243_v7  ;;  %667 = vst.msk [vmem:[%s1324_s7 + $0x68] sm:$0xff] %vm107_vm0, %v643_v8 }
 0x11c   :  { %849 = vst [vmem:[#allocation2 + $0x38] sm:$0xff] %v841_v9  }
 0x11d   :  { %533 = vst [vmem:[#allocation4 + $0x78] sm:$0xff] %v802_v39 }
 0x11e   :  { %938 = shalt.err (!%p935_p4)
}
 0x11f   :  { %s939_s11 = scalar_lea.hbm %s1322_s5, 1024 }
 0x120   :  { %p940_p5 = scmp.ne.s32.totalorder %s1322_s5, %s939_s11  ;;  %p943_p6 = scmp.lt.u32.totalorder %s939_s11, %s1322_s5 }
 0x122   :  { %p945_p7 = pnand %p943_p6, %p940_p5 }
 0x124   :  { %948 = shalt.err (!%p945_p7)
}
 0x125   :  { %s978_s7 = smov 64   ;;  %s979_s16 = smov 4  }
 0x126   :  { %681 = dma.vmem_to_hbm [thread:$0]  %s676_s23, 1024, %s1322_s5, [#allocation3], %s978_s7, %s978_s7, %s979_s16  }
 0x127   :  { %s949_s19 = scalar_lea.vmem %s1282_s24, 2048  ;;  %p954_p9 = scmp.lt.s32.totalorder %s1282_s24, %s1282_s24 }
 0x128   :  { %p950_p8 = scmp.ne.s32.totalorder %s1282_s24, %s949_s19  ;;  %p955_p10 = scmp.lt.s32.totalorder %s949_s19, %s949_s19 }
 0x12a   :  { %p956_p11 = por %p955_p10, %p954_p9 }
 0x12c   :  { %p957_p12 = pnand %p956_p11, %p950_p8 }
 0x12e   :  { %960 = shalt.err (!%p957_p12)
}
 0x12f   :  { %s961_s21 = scalar_lea.hbm %s1323_s6, 2048 }
 0x130   :  { %p962_p13 = scmp.ne.s32.totalorder %s1323_s6, %s961_s21  ;;  %p965_p0 = scmp.lt.u32.totalorder %s961_s21, %s1323_s6 }
 0x132   :  { %p967_p1 = pnand %p965_p0, %p962_p13 }
 0x134   :  { %970 = shalt.err (!%p967_p1)
}
 0x135   :  { %s980_s5 = smov 128   ;;  %s981_s23 = smov 8  }
 0x136   :  { %693 = dma.vmem_to_hbm [thread:$0]  %s1282_s24, 2048, %s1323_s6, [#allocation5], %s980_s5, %s980_s5, %s981_s23  }
 0x137   :  { %971 = dma.done.wait [#allocation3], 1024  }
 0x138   :  { %972 = vsyncadd [#allocation3], 4294966272 }
 0x139   :  { %973 = dma.done.wait [#allocation5], 2048  }
 0x13a   :  { %974 = vsyncadd [#allocation5], 4294965248 }
 0x13b   :  { %704 = vsyncpa [#allocation3], 1 }
 0x13c   :  { %705 = vsyncpa [#allocation5], 1 }

</bundles_post_ra>
